<compile_context>
chip_gen: v6e
topology: v6e:2x2x1
jax: 0.10.0
libtpu: 0.0.40
codegen_flags: <defaults>
</compile_context>

<pallas_src>
import functools

import jax
import jax.numpy as jnp
from jax.experimental import pallas as pl
from jax.experimental.pallas import tpu as pltpu


def _round_up(x, m):
    return (x + m - 1) // m * m


def _elu(z, alpha):
    # PyTorch ELU: z if z > 0 else alpha * (exp(z) - 1).
    return jnp.where(z > 0, z, alpha * (jnp.exp(jnp.minimum(z, 0.0)) - 1.0))


def _mlp_kernel(x_ref, w0_ref, b0_ref, w1_ref, b1_ref, w2_ref, b2_ref,
                w3_ref, b3_ref, o_ref, *, alpha, outdim):
    # x arrives f32 (single HBM read) and is cast to bf16 here on the VPU;
    # bf16 MXU operands, f32 accumulation, f32 elementwise/softmax math.
    x = x_ref[...].astype(jnp.bfloat16)

    z0 = jnp.dot(x, w0_ref[...], preferred_element_type=jnp.float32) + b0_ref[...]
    a0 = _elu(z0, alpha)
    # TODO(synk): nn.Dropout(lbd) is identity in eval mode; training-mode
    # stochastic masking is not implemented here.

    z1 = jnp.dot(a0.astype(jnp.bfloat16), w1_ref[...],
                 preferred_element_type=jnp.float32) + b1_ref[...]
    a1 = _elu(z1, alpha)

    z2 = jnp.dot(a1.astype(jnp.bfloat16), w2_ref[...],
                 preferred_element_type=jnp.float32) + b2_ref[...]
    a2 = _elu(z2, alpha)

    # Final layer padded to 128 lanes (lane-dense MXU output). Padded lanes
    # carry a -1e9 bias, so exp() underflows to exactly 0 and the softmax over
    # the real lanes is unchanged.
    logits = jnp.dot(a2.astype(jnp.bfloat16), w3_ref[...],
                     preferred_element_type=jnp.float32) + b3_ref[...]

    m = jnp.max(logits, axis=1, keepdims=True)
    e = jnp.exp(logits - m)
    denom = jnp.sum(e, axis=1, keepdims=True)
    # Exact division (NOT approx reciprocal): rows sum to 1 within f32 eps.
    probs = e / denom

    # Store only the real classes: 32 B/row of HBM writeback instead of the
    # 512 B/row padded slab; the (bb, outdim) block spans the full minor dim,
    # so the HBM side of the output DMA stays contiguous.
    o_ref[...] = probs[:, :outdim].astype(o_ref.dtype)


def prepare_params(params):
    """One-time conversion of Linear params into kernel-ready operands.

    params: dict with w0..w3 stored as (in, out) and b0..b3 as (1, out)
            (equivalent to PyTorch Linear: y = x @ W.T + b with W (out, in)).
    Call once outside the per-forward path (avoids re-emitting tiny XLA
    cast/pad kernels on every invocation).
    """
    outdim = params["w3"].shape[1]
    out_pad = _round_up(outdim, 128)
    return {
        "w0": params["w0"].astype(jnp.bfloat16),
        "w1": params["w1"].astype(jnp.bfloat16),
        "w2": params["w2"].astype(jnp.bfloat16),
        "w3": jnp.pad(params["w3"],
                      ((0, 0), (0, out_pad - outdim))).astype(jnp.bfloat16),
        "b0": params["b0"].astype(jnp.float32),
        "b1": params["b1"].astype(jnp.float32),
        "b2": params["b2"].astype(jnp.float32),
        # Padded logit lanes get a huge negative bias -> zero probability.
        "b3": jnp.pad(params["b3"].astype(jnp.float32),
                      ((0, 0), (0, out_pad - outdim)), constant_values=-1e9),
    }


def smoothness_classifier_forward(x, prepped, *, outdim, alpha, block_b=4096):
    """Forward pass of smoothness_classifier as one fused Pallas kernel.

    x: (B, indim) float32
    prepped: output of prepare_params()
    block_b: requested batch tile (rows). Default 4096 is safe for v7x's
             32 MiB scoped VMEM; sweep 2048-8192 (raise vmem_limit_bytes on
             v5e/v6e for the larger end).
    """
    B, indim = x.shape

    # Batch tile: multiple of 16 (bf16 sublane packing).
    b16 = _round_up(B, 16)
    bb = max(16, min((block_b // 16) * 16, b16))
    # Keep >= 4 grid steps when the batch allows it, so the "parallel" batch
    # axis still splits across v7x's two TensorCores with pipelining room.
    if b16 >= 4 * 16:
        bb = min(bb, _round_up(pl.cdiv(b16, 4), 16))
    b_pad = _round_up(B, bb)
    grid = (b_pad // bb,)

    # Pad batch with zero rows (sliced off below). x stays f32 — the bf16
    # cast happens inside the kernel.
    x_p = jnp.pad(x, ((0, b_pad - B), (0, 0))) if b_pad != B else x

    def x_map(i):
        return (i, 0)

    def rep_map(i):
        # Constant block index: weights/biases stay resident in VMEM.
        return (0, 0)

    in_specs = [
        pl.BlockSpec((bb, indim), x_map),
        pl.BlockSpec(prepped["w0"].shape, rep_map),
        pl.BlockSpec(prepped["b0"].shape, rep_map),
        pl.BlockSpec(prepped["w1"].shape, rep_map),
        pl.BlockSpec(prepped["b1"].shape, rep_map),
        pl.BlockSpec(prepped["w2"].shape, rep_map),
        pl.BlockSpec(prepped["b2"].shape, rep_map),
        pl.BlockSpec(prepped["w3"].shape, rep_map),
        pl.BlockSpec(prepped["b3"].shape, rep_map),
    ]
    # Narrow (unpadded) output block: covers the full minor dim -> legal
    # block shape, contiguous HBM writeback, no wrapper-side column slice.
    out_spec = pl.BlockSpec((bb, outdim), x_map)

    kernel = functools.partial(_mlp_kernel, alpha=alpha, outdim=outdim)

    out = pl.pallas_call(
        kernel,
        out_shape=jax.ShapeDtypeStruct((b_pad, outdim), jnp.float32),
        grid_spec=pltpu.PrefetchScalarGridSpec(
            num_scalar_prefetch=0,
            grid=grid,
            in_specs=in_specs,
            out_specs=out_spec,
        ),
        compiler_params=pltpu.CompilerParams(
            dimension_semantics=("parallel",),
            # Safe on every generation for bb <= 4096 (incl. v7x's 64 MiB
            # physical VMEM); raise alongside block_b on v5e/v6e.
            vmem_limit_bytes=32 * 1024 * 1024,
        ),
    )(x_p, prepped["w0"], prepped["b0"], prepped["w1"], prepped["b1"],
      prepped["w2"], prepped["b2"], prepped["w3"], prepped["b3"])

    return out[:B] if b_pad != B else out


def init_params(key, indim, h, outdim):
    """Deterministic synthetic parameters (Linear weights stored as (in, out))."""
    dims = [indim, h[0], h[1], h[2], outdim]
    params = {}
    for i in range(4):
        key, kw, kb = jax.random.split(key, 3)
        fan_in = dims[i]
        bound = 1.0 / jnp.sqrt(fan_in)
        params[f"w{i}"] = jax.random.uniform(
            kw, (dims[i], dims[i + 1]), jnp.float32, -bound, bound)
        params[f"b{i}"] = jax.random.uniform(
            kb, (1, dims[i + 1]), jnp.float32, -bound, bound)
    return params


if __name__ == "__main__":
    # Module hyper-params (synthetic, small)
    indim = 32
    h = (64, 64, 32)
    outdim = 8
    alpha = 1.0   # ELU alpha
    lbd = 0.1     # dropout prob (identity at inference)
    B = 8

    key = jax.random.PRNGKey(0)
    kx, kp = jax.random.split(key)
    x = jax.random.normal(kx, (B, indim), jnp.float32)
    params = init_params(kp, indim, h, outdim)
    prepped = prepare_params(params)

    probs = smoothness_classifier_forward(x, prepped, outdim=outdim, alpha=alpha)
    probs = jax.block_until_ready(probs)

    # sanity: shape + softmax rows summing to ~1 (exact divide => f32 eps)
    assert probs.shape == (B, outdim)
    assert bool(jnp.all(jnp.abs(jnp.sum(probs, axis=1) - 1.0) < 1e-3))

    # reference in plain JAX (f32); bf16 MXU operands => ~1e-2-level error,
    # so use a loosened tolerance.
    def ref_forward(x, p):
        def elu(z):
            return jnp.where(z > 0, z, alpha * (jnp.exp(jnp.minimum(z, 0.0)) - 1.0))
        a = elu(x @ p["w0"] + p["b0"])
        a = elu(a @ p["w1"] + p["b1"])
        a = elu(a @ p["w2"] + p["b2"])
        logits = a @ p["w3"] + p["b3"]
        return jax.nn.softmax(logits, axis=1)

    ref = ref_forward(x, params)
    assert bool(jnp.max(jnp.abs(ref - probs)) < 2.5e-2)

    print("KERNEL_OK")
</pallas_src>

<mosaic_0001>
module attributes {stable_mosaic.version = 11 : i64} {
  func.func @_mlp_kernel(%arg0: i32, %arg1: memref<16x32xf32, #tpu.memory_space<vmem>>, %arg2: memref<32x64xbf16, #tpu.memory_space<vmem>>, %arg3: memref<1x64xf32, #tpu.memory_space<vmem>>, %arg4: memref<64x64xbf16, #tpu.memory_space<vmem>>, %arg5: memref<1x64xf32, #tpu.memory_space<vmem>>, %arg6: memref<64x32xbf16, #tpu.memory_space<vmem>>, %arg7: memref<1x32xf32, #tpu.memory_space<vmem>>, %arg8: memref<32x128xbf16, #tpu.memory_space<vmem>>, %arg9: memref<1x128xf32, #tpu.memory_space<vmem>>, %arg10: memref<16x8xf32, #tpu.memory_space<vmem>>) attributes {dimension_semantics = [#tpu.dimension_semantics<parallel>], iteration_bounds = array<i64: 1>, scalar_prefetch = 0 : i64, scratch_operands = 0 : i64, tpu.core_type = #tpu.core_type<tc>, window_params = [{transform_indices = @transform_0, window_bounds = array<i64: 16, 32>}, {pipeline_mode = #tpu.pipeline_mode<synchronous>, transform_indices = @transform_1, window_bounds = array<i64: 32, 64>}, {pipeline_mode = #tpu.pipeline_mode<synchronous>, transform_indices = @transform_2, window_bounds = array<i64: 1, 64>}, {pipeline_mode = #tpu.pipeline_mode<synchronous>, transform_indices = @transform_3, window_bounds = array<i64: 64, 64>}, {pipeline_mode = #tpu.pipeline_mode<synchronous>, transform_indices = @transform_4, window_bounds = array<i64: 1, 64>}, {pipeline_mode = #tpu.pipeline_mode<synchronous>, transform_indices = @transform_5, window_bounds = array<i64: 64, 32>}, {pipeline_mode = #tpu.pipeline_mode<synchronous>, transform_indices = @transform_6, window_bounds = array<i64: 1, 32>}, {pipeline_mode = #tpu.pipeline_mode<synchronous>, transform_indices = @transform_7, window_bounds = array<i64: 32, 128>}, {pipeline_mode = #tpu.pipeline_mode<synchronous>, transform_indices = @transform_8, window_bounds = array<i64: 1, 128>}, {transform_indices = @transform_9, window_bounds = array<i64: 16, 8>}]} {
    %c0 = arith.constant 0 : index
    %c0_0 = arith.constant 0 : index
    %0 = vector.load %arg1[%c0, %c0_0] : memref<16x32xf32, #tpu.memory_space<vmem>>, vector<16x32xf32>
    %1 = arith.truncf %0 : vector<16x32xf32> to vector<16x32xbf16>
    %c0_1 = arith.constant 0 : index
    %c0_2 = arith.constant 0 : index
    %2 = vector.load %arg2[%c0_1, %c0_2] : memref<32x64xbf16, #tpu.memory_space<vmem>>, vector<32x64xbf16>
    %cst = arith.constant dense<0.000000e+00> : vector<16x64xf32>
    %3 = tpu.matmul %1, %2, %cst {dimension_numbers = #tpu.dot_dimension_numbers<[1], [0], [0], [1], [0, 0, 1, 1], [], []>} : vector<16x32xbf16>, vector<32x64xbf16>, vector<16x64xf32> -> vector<16x64xf32>
    %c0_3 = arith.constant 0 : index
    %c0_4 = arith.constant 0 : index
    %4 = vector.load %arg3[%c0_3, %c0_4] : memref<1x64xf32, #tpu.memory_space<vmem>>, vector<1x64xf32>
    %5 = vector.broadcast %4 : vector<1x64xf32> to vector<16x64xf32>
    %6 = arith.addf %3, %5 : vector<16x64xf32>
    %cst_5 = arith.constant 0.000000e+00 : f32
    %7 = vector.broadcast %cst_5 : f32 to vector<16x64xf32>
    %8 = arith.cmpf ogt, %6, %7 : vector<16x64xf32>
    %cst_6 = arith.constant 0.000000e+00 : f32
    %9 = vector.broadcast %cst_6 : f32 to vector<16x64xf32>
    %10 = arith.minimumf %6, %9 : vector<16x64xf32>
    %11 = math.exp %10 : vector<16x64xf32>
    %cst_7 = arith.constant 1.000000e+00 : f32
    %12 = vector.broadcast %cst_7 : f32 to vector<16x64xf32>
    %13 = arith.subf %11, %12 : vector<16x64xf32>
    %cst_8 = arith.constant 1.000000e+00 : f32
    %14 = vector.broadcast %cst_8 : f32 to vector<16x64xf32>
    %15 = arith.mulf %14, %13 : vector<16x64xf32>
    %16 = arith.select %8, %6, %15 : vector<16x64xi1>, vector<16x64xf32>
    %17 = arith.truncf %16 : vector<16x64xf32> to vector<16x64xbf16>
    %c0_9 = arith.constant 0 : index
    %c0_10 = arith.constant 0 : index
    %18 = vector.load %arg4[%c0_9, %c0_10] : memref<64x64xbf16, #tpu.memory_space<vmem>>, vector<64x64xbf16>
    %cst_11 = arith.constant dense<0.000000e+00> : vector<16x64xf32>
    %19 = tpu.matmul %17, %18, %cst_11 {dimension_numbers = #tpu.dot_dimension_numbers<[1], [0], [0], [1], [0, 0, 1, 1], [], []>} : vector<16x64xbf16>, vector<64x64xbf16>, vector<16x64xf32> -> vector<16x64xf32>
    %c0_12 = arith.constant 0 : index
    %c0_13 = arith.constant 0 : index
    %20 = vector.load %arg5[%c0_12, %c0_13] : memref<1x64xf32, #tpu.memory_space<vmem>>, vector<1x64xf32>
    %21 = vector.broadcast %20 : vector<1x64xf32> to vector<16x64xf32>
    %22 = arith.addf %19, %21 : vector<16x64xf32>
    %cst_14 = arith.constant 0.000000e+00 : f32
    %23 = vector.broadcast %cst_14 : f32 to vector<16x64xf32>
    %24 = arith.cmpf ogt, %22, %23 : vector<16x64xf32>
    %cst_15 = arith.constant 0.000000e+00 : f32
    %25 = vector.broadcast %cst_15 : f32 to vector<16x64xf32>
    %26 = arith.minimumf %22, %25 : vector<16x64xf32>
    %27 = math.exp %26 : vector<16x64xf32>
    %cst_16 = arith.constant 1.000000e+00 : f32
    %28 = vector.broadcast %cst_16 : f32 to vector<16x64xf32>
    %29 = arith.subf %27, %28 : vector<16x64xf32>
    %cst_17 = arith.constant 1.000000e+00 : f32
    %30 = vector.broadcast %cst_17 : f32 to vector<16x64xf32>
    %31 = arith.mulf %30, %29 : vector<16x64xf32>
    %32 = arith.select %24, %22, %31 : vector<16x64xi1>, vector<16x64xf32>
    %33 = arith.truncf %32 : vector<16x64xf32> to vector<16x64xbf16>
    %c0_18 = arith.constant 0 : index
    %c0_19 = arith.constant 0 : index
    %34 = vector.load %arg6[%c0_18, %c0_19] : memref<64x32xbf16, #tpu.memory_space<vmem>>, vector<64x32xbf16>
    %cst_20 = arith.constant dense<0.000000e+00> : vector<16x32xf32>
    %35 = tpu.matmul %33, %34, %cst_20 {dimension_numbers = #tpu.dot_dimension_numbers<[1], [0], [0], [1], [0, 0, 1, 1], [], []>} : vector<16x64xbf16>, vector<64x32xbf16>, vector<16x32xf32> -> vector<16x32xf32>
    %c0_21 = arith.constant 0 : index
    %c0_22 = arith.constant 0 : index
    %36 = vector.load %arg7[%c0_21, %c0_22] : memref<1x32xf32, #tpu.memory_space<vmem>>, vector<1x32xf32>
    %37 = vector.broadcast %36 : vector<1x32xf32> to vector<16x32xf32>
    %38 = arith.addf %35, %37 : vector<16x32xf32>
    %cst_23 = arith.constant 0.000000e+00 : f32
    %39 = vector.broadcast %cst_23 : f32 to vector<16x32xf32>
    %40 = arith.cmpf ogt, %38, %39 : vector<16x32xf32>
    %cst_24 = arith.constant 0.000000e+00 : f32
    %41 = vector.broadcast %cst_24 : f32 to vector<16x32xf32>
    %42 = arith.minimumf %38, %41 : vector<16x32xf32>
    %43 = math.exp %42 : vector<16x32xf32>
    %cst_25 = arith.constant 1.000000e+00 : f32
    %44 = vector.broadcast %cst_25 : f32 to vector<16x32xf32>
    %45 = arith.subf %43, %44 : vector<16x32xf32>
    %cst_26 = arith.constant 1.000000e+00 : f32
    %46 = vector.broadcast %cst_26 : f32 to vector<16x32xf32>
    %47 = arith.mulf %46, %45 : vector<16x32xf32>
    %48 = arith.select %40, %38, %47 : vector<16x32xi1>, vector<16x32xf32>
    %49 = arith.truncf %48 : vector<16x32xf32> to vector<16x32xbf16>
    %c0_27 = arith.constant 0 : index
    %c0_28 = arith.constant 0 : index
    %50 = vector.load %arg8[%c0_27, %c0_28] : memref<32x128xbf16, #tpu.memory_space<vmem>>, vector<32x128xbf16>
    %cst_29 = arith.constant dense<0.000000e+00> : vector<16x128xf32>
    %51 = tpu.matmul %49, %50, %cst_29 {dimension_numbers = #tpu.dot_dimension_numbers<[1], [0], [0], [1], [0, 0, 1, 1], [], []>} : vector<16x32xbf16>, vector<32x128xbf16>, vector<16x128xf32> -> vector<16x128xf32>
    %c0_30 = arith.constant 0 : index
    %c0_31 = arith.constant 0 : index
    %52 = vector.load %arg9[%c0_30, %c0_31] : memref<1x128xf32, #tpu.memory_space<vmem>>, vector<1x128xf32>
    %53 = vector.broadcast %52 : vector<1x128xf32> to vector<16x128xf32>
    %54 = arith.addf %51, %53 : vector<16x128xf32>
    %cst_32 = arith.constant dense<0xFF800000> : vector<16xf32>
    %55 = vector.multi_reduction <maximumf>, %54, %cst_32 [1] : vector<16x128xf32> to vector<16xf32>
    %56 = vector.shape_cast %55 : vector<16xf32> to vector<16x1xf32>
    %57 = vector.broadcast %56 : vector<16x1xf32> to vector<16x128xf32>
    %58 = arith.subf %54, %57 : vector<16x128xf32>
    %59 = math.exp %58 : vector<16x128xf32>
    %cst_33 = arith.constant dense<0.000000e+00> : vector<16xf32>
    %60 = vector.multi_reduction <add>, %59, %cst_33 [1] : vector<16x128xf32> to vector<16xf32>
    %61 = vector.shape_cast %60 : vector<16xf32> to vector<16x1xf32>
    %62 = vector.broadcast %61 : vector<16x1xf32> to vector<16x128xf32>
    %63 = arith.divf %59, %62 : vector<16x128xf32>
    %64 = vector.extract_strided_slice %63 {offsets = [0, 0], sizes = [16, 8], strides = [1, 1]} : vector<16x128xf32> to vector<16x8xf32>
    %c0_34 = arith.constant 0 : index
    %c0_35 = arith.constant 0 : index
    %65 = vector.load %arg10[%c0_34, %c0_35] : memref<16x8xf32, #tpu.memory_space<vmem>>, vector<16x8xf32>
    tpu.vector_store %arg10[%c0_34, %c0_35], %64 {strides = array<i32>} : memref<16x8xf32, #tpu.memory_space<vmem>>, vector<16x8xf32>,
    return
  }
  func.func @transform_0(%arg0: i32) -> (i32, i32) {
    %c0_i32 = arith.constant 0 : i32
    %c0_i32_0 = arith.constant 0 : i32
    return %arg0, %c0_i32 : i32, i32
  }
  func.func @transform_1(%arg0: i32) -> (i32, i32) {
    %c0_i32 = arith.constant 0 : i32
    %c0_i32_0 = arith.constant 0 : i32
    %c0_i32_1 = arith.constant 0 : i32
    return %c0_i32, %c0_i32_0 : i32, i32
  }
  func.func @transform_2(%arg0: i32) -> (i32, i32) {
    %c0_i32 = arith.constant 0 : i32
    %c0_i32_0 = arith.constant 0 : i32
    %c0_i32_1 = arith.constant 0 : i32
    return %c0_i32, %c0_i32_0 : i32, i32
  }
  func.func @transform_3(%arg0: i32) -> (i32, i32) {
    %c0_i32 = arith.constant 0 : i32
    %c0_i32_0 = arith.constant 0 : i32
    %c0_i32_1 = arith.constant 0 : i32
    return %c0_i32, %c0_i32_0 : i32, i32
  }
  func.func @transform_4(%arg0: i32) -> (i32, i32) {
    %c0_i32 = arith.constant 0 : i32
    %c0_i32_0 = arith.constant 0 : i32
    %c0_i32_1 = arith.constant 0 : i32
    return %c0_i32, %c0_i32_0 : i32, i32
  }
  func.func @transform_5(%arg0: i32) -> (i32, i32) {
    %c0_i32 = arith.constant 0 : i32
    %c0_i32_0 = arith.constant 0 : i32
    %c0_i32_1 = arith.constant 0 : i32
    return %c0_i32, %c0_i32_0 : i32, i32
  }
  func.func @transform_6(%arg0: i32) -> (i32, i32) {
    %c0_i32 = arith.constant 0 : i32
    %c0_i32_0 = arith.constant 0 : i32
    %c0_i32_1 = arith.constant 0 : i32
    return %c0_i32, %c0_i32_0 : i32, i32
  }
  func.func @transform_7(%arg0: i32) -> (i32, i32) {
    %c0_i32 = arith.constant 0 : i32
    %c0_i32_0 = arith.constant 0 : i32
    %c0_i32_1 = arith.constant 0 : i32
    return %c0_i32, %c0_i32_0 : i32, i32
  }
  func.func @transform_8(%arg0: i32) -> (i32, i32) {
    %c0_i32 = arith.constant 0 : i32
    %c0_i32_0 = arith.constant 0 : i32
    %c0_i32_1 = arith.constant 0 : i32
    return %c0_i32, %c0_i32_0 : i32, i32
  }
  func.func @transform_9(%arg0: i32) -> (i32, i32) {
    %c0_i32 = arith.constant 0 : i32
    %c0_i32_0 = arith.constant 0 : i32
    return %arg0, %c0_i32 : i32, i32
  }
}

</mosaic_0001>

<bundles_post_ra>
// kernel: tpu_custom_call.1
= control target key start
LH: loop header
LB: loop body
LE: loop exit
PB: predicated region body
PF: predicated region fallthrough
CT: control target
= control target key end

     0   :  { %14 = vsyncpa [#allocation3], 0  ;;  %s730_s0 = inlined_call_operand.vmem [shape: f32[16,32], index: 0, kind: input, shape index: {}]   ;;  %s731_s1 = inlined_call_operand.hbm [shape: bf16[32,64], index: 1, kind: input, shape index: {}]   ;;  %s732_s2 = inlined_call_operand.vmem [shape: f32[1,64], index: 2, kind: input, shape index: {}]   ;;  %s733_s3 = inlined_call_operand.vmem [shape: bf16[64,64], index: 3, kind: input, shape index: {}]   ;;  %s734_s4 = inlined_call_operand.vmem [shape: f32[1,64], index: 4, kind: input, shape index: {}]   ;;  %s735_s5 = inlined_call_operand.vmem [shape: bf16[64,32], index: 5, kind: input, shape index: {}]   ;;  %s736_s6 = inlined_call_operand.vmem [shape: f32[1,32], index: 6, kind: input, shape index: {}]   ;;  %s737_s7 = inlined_call_operand.hbm [shape: bf16[32,128], index: 7, kind: input, shape index: {}]   ;;  %s738_s8 = inlined_call_operand.vmem [shape: f32[1,128], index: 8, kind: input, shape index: {}]   ;;  %s739_s9 = inlined_call_operand.vmem [shape: f32[16,8], index: 9, kind: output, shape index: {}]  }
   0x1   :  { %15 = vsyncpa [#allocation5], 0  ;;  %s596_s30 = smov [#allocation2]  }
   0x2   :  { %s23_s10 = sshll.u32 %s596_s30, 4  ;;  %s24_s10 = int_to_ptr.vmem [resolvable:$true] %s23_s10 }
   0x3   :  { %s560_s11 = scalar_lea.vmem %s24_s10, 256  ;;  %p565_p1 = scmp.lt.s32.totalorder %s24_s10, %s24_s10 }
   0x4   :  { %p561_p0 = scmp.ne.s32.totalorder %s24_s10, %s560_s11  ;;  %p566_p2 = scmp.lt.s32.totalorder %s560_s11, %s560_s11 }
   0x6   :  { %p567_p3 = por %p566_p2, %p565_p1 }
   0x8   :  { %p568_p4 = pnand %p567_p3, %p561_p0 }
   0xa   :  { %571 = shalt.err (!%p568_p4)
}
   0xb   :  { %s597_s12 = smov 64   ;;  %s598_s13 = smov 4  }
   0xc   :  { %29 = dma.hbm_to_vmem [thread:$0]  %s731_s1, 256, %s24_s10, [#allocation3], %s597_s12, %s597_s12, %s598_s13  }
   0xd   :  { %s599_s16 = smov [#allocation4]  }
   0xe   :  { %s45_s17 = sshll.u32 %s599_s16, 4  ;;  %s46_s17 = int_to_ptr.vmem [resolvable:$true] %s45_s17 }
   0xf   :  { %s580_s18 = scalar_lea.vmem %s46_s17, 256  ;;  %p585_p6 = scmp.lt.s32.totalorder %s46_s17, %s46_s17 }
  0x10   :  { %p581_p5 = scmp.ne.s32.totalorder %s46_s17, %s580_s18  ;;  %p586_p7 = scmp.lt.s32.totalorder %s580_s18, %s580_s18 }
  0x12   :  { %p587_p8 = por %p586_p7, %p585_p6 }
  0x14   :  { %p588_p9 = pnand %p587_p8, %p581_p5 }
  0x16   :  { %591 = shalt.err (!%p588_p9)
}
  0x17   :  { %51 = dma.hbm_to_vmem [thread:$0]  %s737_s7, 256, %s46_s17, [#allocation5], %s597_s12, %s597_s12, %s598_s13  }
  0x18   :  { %592 = dma.done.wait [#allocation3], 256  }
  0x19   :  { %593 = vsyncadd [#allocation3], 4294967040 }
  0x1a   :  { %594 = dma.done.wait [#allocation5], 256  }
  0x1b   :  { %595 = vsyncadd [#allocation5], 4294967040  ;;  %v600_v0 = vmov 0.0   ;;  %vm601_vm0 = vmmov 0   ;;  %v520_v1 = vld [vmem:[#allocation2 + $0x8] sm:$0xff]   ;;  %v521_v2 = vld [vmem:[#allocation2] sm:$0xff]  }
  0x1c   :  { %474 = vmatprep.subr.bf16.mxu0 %v600_v0  ;;  %478 = vmatprep.mubr.msk.bf16.mxu0 %vm601_vm0, %v600_v0  ;;  %v61_v3 = vld [vmem:[%s730_s0] sm:$0xff]  ;;  %v62_v4 = vld [vmem:[%s730_s0 + $0x8] sm:$0xff]  ;;  %vm87_vm1 = vcmask 261120   ;;  %v522_v6 = vld [vmem:[%s733_s3 + $0x18] sm:$0xff]   ;;  %vm184_vm4 = vcmask 523264   ;;  %vm423_vm9 = vcmask 64512  }
  0x1d   :  { %482 = vmatprep.subr.bf16.mxu1 %v600_v0  ;;  %490 = vmatprep.mubr.msk.bf16.mxu1 %vm601_vm0, %v600_v0  ;;  %v63_v5 = vpack.c.bf16 %v62_v4, %v61_v3  ;;  %v523_v7 = vld [vmem:[%s733_s3 + $0x10] sm:$0xff]   ;;  %v524_v8 = vld [vmem:[%s733_s3 + $0x8] sm:$0xff]   ;;  %v525_v9 = vld [vmem:[%s733_s3] sm:$0xff]  }
  0x1e   :  { %475 = vmatpush3.bf16.msra.mxu0 %v520_v1  ;;  %483 = vmatpush3.bf16.msra.mxu1 %v522_v6  ;;  %v432_v10 = vld [vmem:[%s732_s2] ss:$0 sm:$0xff]  ;;  %v526_v28 = vld [vmem:[%s735_s5 + $0x18] sm:$0xff]   ;;  %v527_v29 = vld [vmem:[%s735_s5 + $0x10] sm:$0xff]  }
  0x1f   :  { %476 = vmatprep.subr.bf16.mxu0 %v600_v0  ;;  %484 = vmatprep.subr.bf16.mxu1 %v600_v0  ;;  %v528_v30 = vld [vmem:[%s735_s5 + $0x8] sm:$0xff]   ;;  %v529_v31 = vld [vmem:[%s735_s5] sm:$0xff]   ;;  %v530_v50 = vld [vmem:[#allocation4 + $0x8] sm:$0xff]  }
  0x20   :  { %v438_v32 = vld [vmem:[%s734_s4] ss:$0 sm:$0xff]  ;;  %v531_v51 = vld [vmem:[#allocation4] sm:$0xff]  }
  0x21   :  { %v446_v52 = vld [vmem:[%s736_s6] ss:$0 sm:$0xff] }
  0x22   :  { %477 = vmatpush3.bf16.msra.mxu0 %v521_v2  ;;  %485 = vmatpush3.bf16.msra.mxu1 %v523_v7  ;;  %v454_v6 = vld [vmem:[%s738_s8] ss:$0 sm:$0xff] }
  0x23   :  { %494 = vmatprep.subr.bf16.mxu0 %v600_v0  ;;  %486 = vmatprep.subr.bf16.mxu1 %v600_v0 }
  0x25   :  { %479 = vmatmul.mubr.msk.bf16.vlgmr.msra.gmra.mxu0 %vm87_vm1, %v63_v5 }
  0x26   :  { %502 = vmatprep.mubr.msk.bf16.mxu0 %vm601_vm0, %v600_v0  ;;  %487 = vmatpush3.bf16.msra.mxu1 %v524_v8 }
  0x27   :  { %488 = vmatprep.subr.bf16.mxu1 %v600_v0  ;;  %495 = vmatpush3.bf16.msra.mxu0 %v526_v28 }
  0x28   :  { %496 = vmatprep.subr.bf16.mxu0 %v600_v0 }
  0x2a   :  { %489 = vmatpush3.bf16.msra.mxu1 %v525_v9 }
  0x2b   :  { %506 = vmatprep.subr.bf16.mxu1 %v600_v0  ;;  %497 = vmatpush3.bf16.msra.mxu0 %v527_v29 }
  0x2c   :  { %498 = vmatprep.subr.bf16.mxu0 %v600_v0 }
  0x2f   :  { %499 = vmatpush3.bf16.msra.mxu0 %v528_v30 }
  0x30   :  { %500 = vmatprep.subr.bf16.mxu0 %v600_v0 }
  0x33   :  { %501 = vmatpush3.bf16.msra.mxu0 %v529_v31 }
  0xe5   :  { %v125_v11 = vpop.f32.mrf.mxu0 }
  0xe6   :  { %v126_v12 = vadd.f32 %v432_v10, %v125_v11 }
  0xe7   :  { %v480_v13 = vpop.f32.mrf.mxu0 }
  0xe8   :  { %v134_v14 = vmin.f32 %v126_v12, 0.0  ;;  %vm132_vm2 = vcmp.gt.f32.partialorder %v126_v12, 0.0 }
  0xe9   :  { %v128_v15 = vpop.f32.mrf.mxu0 }
  0xea   :  { %v136_v16 = vmul.f32 1.442695, %v134_v14  ;;  %v129_v17 = vadd.f32 %v432_v10, %v128_v15 }
  0xeb   :  { %v481_v18 = vpop.f32.mrf.mxu0 }
  0xec   :  { %532 = vpow2.f32 %v136_v16  ;;  %v135_v19 = vmin.f32 %v129_v17, 0.0  ;;  %vm133_vm3 = vcmp.gt.f32.partialorder %v129_v17, 0.0 }
  0xee   :  { %v138_v20 = vmul.f32 1.442695, %v135_v19 }
  0xf0   :  { %534 = vpow2.f32 %v138_v20 }
  0xf9   :  { %v533_v21 = vpop.eup %532 }
  0xfa   :  { %v436_v22 = vadd.f32 -1.0, %v533_v21 }
  0xfc   :  { %v142_v25 = vsel %vm132_vm2, %v126_v12, %v436_v22 }
  0xfd   :  { %v535_v23 = vpop.eup %534 }
  0xfe   :  { %v437_v24 = vadd.f32 -1.0, %v535_v23 }
 0x100   :  { %v143_v26 = vsel %vm133_vm3, %v129_v17, %v437_v24 }
 0x101   :  { %v144_v27 = vpack.c.bf16 %v143_v26, %v142_v25 }
 0x103   :  { %491 = vmatmul.mubr.msk.bf16.vlgmr.msra.gmra.mxu1 %vm184_vm4, %v144_v27 }
 0x104   :  { %510 = vmatprep.mubr.msk.bf16.mxu1 %vm601_vm0, %v600_v0  ;;  %507 = vmatpush3.bf16.msra.mxu1 %v530_v50 }
 0x105   :  { %508 = vmatprep.subr.bf16.mxu1 %v600_v0 }
 0x108   :  { %509 = vmatpush3.bf16.msra.mxu1 %v531_v51 }
 0x1c3   :  { %v222_v33 = vpop.f32.mrf.mxu1 }
 0x1c4   :  { %v223_v34 = vadd.f32 %v438_v32, %v222_v33 }
 0x1c5   :  { %v492_v35 = vpop.f32.mrf.mxu1 }
 0x1c6   :  { %v231_v36 = vmin.f32 %v223_v34, 0.0  ;;  %vm229_vm5 = vcmp.gt.f32.partialorder %v223_v34, 0.0 }
 0x1c7   :  { %v225_v37 = vpop.f32.mrf.mxu1 }
 0x1c8   :  { %v233_v38 = vmul.f32 1.442695, %v231_v36  ;;  %v226_v39 = vadd.f32 %v438_v32, %v225_v37 }
 0x1c9   :  { %v493_v40 = vpop.f32.mrf.mxu1 }
 0x1ca   :  { %536 = vpow2.f32 %v233_v38  ;;  %v232_v41 = vmin.f32 %v226_v39, 0.0  ;;  %vm230_vm6 = vcmp.gt.f32.partialorder %v226_v39, 0.0 }
 0x1cc   :  { %v235_v42 = vmul.f32 1.442695, %v232_v41 }
 0x1ce   :  { %538 = vpow2.f32 %v235_v42 }
 0x1d7   :  { %v537_v43 = vpop.eup %536 }
 0x1d8   :  { %v444_v44 = vadd.f32 -1.0, %v537_v43 }
 0x1da   :  { %v239_v47 = vsel %vm229_vm5, %v223_v34, %v444_v44 }
 0x1db   :  { %v539_v45 = vpop.eup %538 }
 0x1dc   :  { %v445_v46 = vadd.f32 -1.0, %v539_v45 }
 0x1de   :  { %v240_v48 = vsel %vm230_vm6, %v226_v39, %v445_v46 }
 0x1df   :  { %v241_v49 = vpack.c.bf16 %v240_v48, %v239_v47 }
 0x1e1   :  { %503 = vmatmul.mubr.msk.bf16.vlgmr.msra.gmra.mxu0 %vm184_vm4, %v241_v49 }
 0x2a1   :  { %v318_v53 = vpop.f32.mrf.mxu0 }
 0x2a2   :  { %v319_v54 = vadd.f32 %v446_v52, %v318_v53 }
 0x2a3   :  { %v504_v55 = vpop.f32.mrf.mxu0 }
 0x2a4   :  { %v327_v56 = vmin.f32 %v319_v54, 0.0  ;;  %vm325_vm7 = vcmp.gt.f32.partialorder %v319_v54, 0.0 }
 0x2a5   :  { %v321_v57 = vpop.f32.mrf.mxu0 }
 0x2a6   :  { %v329_v58 = vmul.f32 1.442695, %v327_v56  ;;  %v322_v59 = vadd.f32 %v446_v52, %v321_v57 }
 0x2a7   :  { %v505_v60 = vpop.f32.mrf.mxu0 }
 0x2a8   :  { %540 = vpow2.f32 %v329_v58  ;;  %v328_v61 = vmin.f32 %v322_v59, 0.0  ;;  %vm326_vm8 = vcmp.gt.f32.partialorder %v322_v59, 0.0 }
 0x2aa   :  { %v331_v62 = vmul.f32 1.442695, %v328_v61 }
 0x2ac   :  { %542 = vpow2.f32 %v331_v62 }
 0x2b5   :  { %v541_v63 = vpop.eup %540 }
 0x2b6   :  { %v452_v0 = vadd.f32 -1.0, %v541_v63 }
 0x2b8   :  { %v335_v3 = vsel %vm325_vm7, %v319_v54, %v452_v0 }
 0x2b9   :  { %v543_v1 = vpop.eup %542 }
 0x2ba   :  { %v453_v2 = vadd.f32 -1.0, %v543_v1 }
 0x2bc   :  { %v336_v4 = vsel %vm326_vm8, %v322_v59, %v453_v2 }
 0x2bd   :  { %v337_v5 = vpack.c.bf16 %v336_v4, %v335_v3 }
 0x2bf   :  { %511 = vmatmul.mubr.msk.bf16.vlgmr.msra.gmra.mxu1 %vm87_vm1, %v337_v5 }
 0x37f   :  { %v398_v7 = vpop.f32.mrf.mxu1 }
 0x380   :  { %v399_v8 = vadd.f32 %v454_v6, %v398_v7 }
 0x381   :  { %v512_v9 = vpop.f32.mrf.mxu1 }
 0x382   :  { %405 = vmax.xlane.f32.xlu0 %v399_v8 }
 0x383   :  { %v401_v10 = vpop.f32.mrf.mxu1 }
 0x384   :  { %v402_v11 = vadd.f32 %v454_v6, %v401_v10 }
 0x385   :  { %v513_v12 = vpop.f32.mrf.mxu1 }
 0x386   :  { %407 = vmax.xlane.f32.xlu0 %v402_v11 }
 0x40b   :  { %v406_v13 = vpop.xlane.xlu0 %405 }
 0x40c   :  { %v409_v14 = vsub.f32 %v399_v8, %v406_v13 }
 0x40e   :  { %v411_v15 = vmul.f32 1.442695, %v409_v14 }
 0x40f   :  { %v408_v16 = vpop.xlane.xlu0 %407 }
 0x410   :  { %544 = vpow2.f32 %v411_v15  ;;  %v410_v17 = vsub.f32 %v402_v11, %v408_v16 }
 0x412   :  { %v413_v18 = vmul.f32 1.442695, %v410_v17 }
 0x414   :  { %546 = vpow2.f32 %v413_v18 }
 0x41d   :  { %v545_v19 = vpop.eup %544 }
 0x41e   :  { %415 = vadd.xlane.f32.xlu1 %v545_v19 }
 0x421   :  { %v547_v20 = vpop.eup %546 }
 0x422   :  { %417 = vadd.xlane.f32.xlu1 %v547_v20 }
 0x4a7   :  { %v416_v21 = vpop.xlane.xlu1 %415 }
 0x4a8   :  { %548 = vrcp.f32 %v416_v21 }
 0x4ab   :  { %v418_v22 = vpop.xlane.xlu1 %417 }
 0x4ac   :  { %550 = vrcp.f32 %v418_v22 }
 0x4b5   :  { %v549_v23 = vpop.eup %548 }
 0x4b6   :  { %v420_v24 = vmul.f32 %v549_v23, %v545_v19 }
 0x4b8   :  { %424 = vst.msk [vmem:[%s739_s9] sm:$0xff] %vm423_vm9, %v420_v24 }
 0x4b9   :  { %v551_v25 = vpop.eup %550 }
 0x4ba   :  { %v422_v26 = vmul.f32 %v551_v25, %v547_v20 }
 0x4bc   :  { %425 = vst.msk [vmem:[%s739_s9 + $0x8] sm:$0xff] %vm423_vm9, %v422_v26 }
 0x4bd   :  { %430 = vsyncpa [#allocation3], 1 }
 0x4be   :  { %431 = vsyncpa [#allocation5], 1 }

</bundles_post_ra>
